<compile_context>
chip_gen: v7x
topology: tpu7x:2x2x1
jax: 0.10.0
libtpu: 0.0.40
codegen_flags: <defaults>
</compile_context>

<pallas_src>
import jax
import jax.numpy as jnp
from jax import lax
from jax.experimental import pallas as pl
from jax.experimental.pallas import tpu as pltpu


def lstm_kernel(x_ref,          # (S, B, D)  time-major input
                wx_ref,         # (D, 4H)    fused input weights (pre-transposed)
                wh_ref,         # (H, 4H)    fused recurrent weights (NOT transposed, like the module)
                b_ref,          # (1, 4H)    fused gate biases
                wp_ref,         # (H, CP)    classifier weights, padded to CP lanes
                bp_ref,         # (1, CP)    classifier bias, padded
                p_ref,          # (B, CP)    output logits (padded)
                xw_scr):        # VMEM (S, B, 4H) precomputed input contribution
    S, B, D = x_ref.shape
    H = wh_ref.shape[0]
    H4 = wh_ref.shape[1]

    # ---- Hoisted input contribution + bias for all timesteps: (S, B, 4H) ----
    b_bcast = b_ref[...].reshape(1, 1, H4)
    if D == 1:
        # (S,B,1) * (1,1,4H) broadcast outer product (avoids degenerate K=1 matmul)
        xw_scr[...] = x_ref[...] * wx_ref[...].reshape(1, 1, H4) + b_bcast
    else:
        xw_scr[...] = (
            lax.dot_general(x_ref[...], wx_ref[...],
                            (((2,), (0,)), ((), ())),
                            preferred_element_type=jnp.float32)
            + b_bcast)

    wh = wh_ref[...]  # keep fused recurrent weights resident for the whole loop

    # ---- Recurrence: h/c carried in vregs, single fused matmul per step ----
    def step(t, carry):
        h, c = carry
        pre = xw_scr[t] + jnp.dot(h, wh, preferred_element_type=jnp.float32)  # (B, 4H)
        g = jnp.tanh(pre[:, 0 * H:1 * H])
        i = jax.nn.sigmoid(pre[:, 1 * H:2 * H])
        f = jax.nn.sigmoid(pre[:, 2 * H:3 * H])
        o = jax.nn.sigmoid(pre[:, 3 * H:4 * H])
        c_new = g * i + c * f
        h_new = jnp.tanh(c_new) * o
        return h_new, c_new

    h0 = jnp.zeros((B, H), jnp.float32)
    c0 = jnp.zeros((B, H), jnp.float32)
    h, _ = lax.fori_loop(0, S, step, (h0, c0), unroll=True)

    # ---- Final projection, lane-dense padded store ----
    p = jnp.dot(h, wp_ref[...], preferred_element_type=jnp.float32) + bp_ref[...]
    p_ref[...] = p.astype(p_ref.dtype)


def lstm_forward(x, params):
    (wgx, wgh, bg, wix, wih, bi,
     wfx, wfh, bf, wox, woh, bo, wph, bp) = params

    B, S = x.shape
    H, D = wgx.shape
    C = wph.shape[0]
    H4 = 4 * H
    CP = 128 * ((C + 127) // 128)   # pad classifier dim to lane width

    f32 = jnp.float32
    # time-major input: (seq, batch, input_dim)
    x_seq = jnp.transpose(x).reshape(S, B, D).astype(f32)

    # Fused gate weights.  Module computes: x @ Wx.T + h @ Wh + b  per gate.
    wx_f = jnp.concatenate(
        [wgx.T, wix.T, wfx.T, wox.T], axis=1).astype(f32)      # (D, 4H)
    wh_f = jnp.concatenate(
        [wgh, wih, wfh, woh], axis=1).astype(f32)               # (H, 4H)
    b_f = jnp.concatenate([bg, bi, bf, bo]).reshape(1, H4).astype(f32)

    # Padded classifier params (lane-dense final matmul / store).
    wp_pad = jnp.zeros((H, CP), f32).at[:, :C].set(wph.T.astype(f32))
    bp_pad = jnp.zeros((1, CP), f32).at[:, :C].set(bp.reshape(1, C).astype(f32))

    # TODO(synk): for large H on v6e/v7x, cast wx_f/wh_f to bf16 (keep f32
    # accumulation and f32 h/c) and budget VMEM per generation; irrelevant at H=32.

    grid_spec = pltpu.PrefetchScalarGridSpec(
        num_scalar_prefetch=0,
        grid=(1,),
        in_specs=[
            pl.BlockSpec((S, B, D), lambda i: (0, 0, 0)),   # x (whole sequence)
            pl.BlockSpec((D, H4),   lambda i: (0, 0)),      # Wx fused
            pl.BlockSpec((H, H4),   lambda i: (0, 0)),      # Wh fused
            pl.BlockSpec((1, H4),   lambda i: (0, 0)),      # b fused
            pl.BlockSpec((H, CP),   lambda i: (0, 0)),      # Wp^T padded
            pl.BlockSpec((1, CP),   lambda i: (0, 0)),      # bp padded
        ],
        out_specs=pl.BlockSpec((B, CP), lambda i: (0, 0)),
        scratch_shapes=[pltpu.VMEM((S, B, H4), jnp.float32)],  # xw staging
    )

    out_padded = pl.pallas_call(
        lstm_kernel,
        out_shape=jax.ShapeDtypeStruct((B, CP), jnp.float32),
        grid_spec=grid_spec,
        compiler_params=pltpu.CompilerParams(
            dimension_semantics=("arbitrary",)),
    )(x_seq, wx_f, wh_f, b_f, wp_pad, bp_pad)

    return out_padded[:, :C]


def lstm_reference(x, params):
    """Pure-JAX mirror of the PyTorch forward (linear=False)."""
    (wgx, wgh, bg, wix, wih, bi,
     wfx, wfh, bf, wox, woh, bo, wph, bp) = params
    B, S = x.shape
    H = wgh.shape[0]
    h = jnp.zeros((B, H), jnp.float32)
    c = jnp.zeros((B, H), jnp.float32)
    for t in range(S):
        xt = x[:, t][:, None].astype(jnp.float32)
        g = jnp.tanh(xt @ wgx.T + h @ wgh + bg)
        i = jax.nn.sigmoid(xt @ wix.T + h @ wih + bi)
        f = jax.nn.sigmoid(xt @ wfx.T + h @ wfh + bf)
        o = jax.nn.sigmoid(xt @ wox.T + h @ woh + bo)
        c = g * i + c * f
        h = jnp.tanh(c) * o
    return h @ wph.T + bp


def init_params(key, input_dim, num_hidden, num_classes):
    def xavier(k, shape):
        fan_out, fan_in = shape
        bound = (6.0 / (fan_in + fan_out)) ** 0.5
        return jax.random.uniform(k, shape, jnp.float32, -bound, bound)

    ks = jax.random.split(key, 9)
    H, D, C = num_hidden, input_dim, num_classes
    wgx = xavier(ks[0], (H, D)); wgh = xavier(ks[1], (H, H)); bg = jnp.zeros((H,), jnp.float32)
    wix = xavier(ks[2], (H, D)); wih = xavier(ks[3], (H, H)); bi = jnp.zeros((H,), jnp.float32)
    wfx = xavier(ks[4], (H, D)); wfh = xavier(ks[5], (H, H)); bf = 2.0 * jnp.ones((H,), jnp.float32)
    wox = xavier(ks[6], (H, D)); woh = xavier(ks[7], (H, H)); bo = jnp.zeros((H,), jnp.float32)
    wph = xavier(ks[8], (C, H)); bp = jnp.zeros((C,), jnp.float32)
    return (wgx, wgh, bg, wix, wih, bi, wfx, wfh, bf, wox, woh, bo, wph, bp)


if __name__ == "__main__":
    # Small shapes implied by the module: scalar inputs per step (input_dim=1).
    batch, seq_length, input_dim, num_hidden, num_classes = 8, 8, 1, 32, 10

    key = jax.random.PRNGKey(0)
    k_x, k_p = jax.random.split(key)
    x = jax.random.randint(k_x, (batch, seq_length), 0, 10).astype(jnp.float32)
    params = init_params(k_p, input_dim, num_hidden, num_classes)

    out = lstm_forward(x, params)
    out = jax.block_until_ready(out)

    ref = lstm_reference(x, params)
    assert out.shape == (batch, num_classes)
    assert jnp.allclose(out, ref, atol=1e-5, rtol=1e-5), "mismatch vs JAX reference"

    print("KERNEL_OK")
</pallas_src>

<mosaic_0001>
module attributes {stable_mosaic.version = 11 : i64} {
  func.func @lstm_kernel(%arg0: i32, %arg1: memref<8x8x1xf32, #tpu.memory_space<vmem>>, %arg2: memref<1x128xf32, #tpu.memory_space<vmem>>, %arg3: memref<32x128xf32, #tpu.memory_space<vmem>>, %arg4: memref<1x128xf32, #tpu.memory_space<vmem>>, %arg5: memref<32x128xf32, #tpu.memory_space<vmem>>, %arg6: memref<1x128xf32, #tpu.memory_space<vmem>>, %arg7: memref<8x128xf32, #tpu.memory_space<vmem>>, %arg8: memref<8x8x128xf32, #tpu.memory_space<vmem>>) attributes {dimension_semantics = [#tpu.dimension_semantics<arbitrary>], iteration_bounds = array<i64: 1>, scalar_prefetch = 0 : i64, scratch_operands = 1 : i64, tpu.core_type = #tpu.core_type<tc>, window_params = [{pipeline_mode = #tpu.pipeline_mode<synchronous>, transform_indices = @transform_0, window_bounds = array<i64: 8, 8, 1>}, {pipeline_mode = #tpu.pipeline_mode<synchronous>, transform_indices = @transform_1, window_bounds = array<i64: 1, 128>}, {pipeline_mode = #tpu.pipeline_mode<synchronous>, transform_indices = @transform_2, window_bounds = array<i64: 32, 128>}, {pipeline_mode = #tpu.pipeline_mode<synchronous>, transform_indices = @transform_3, window_bounds = array<i64: 1, 128>}, {pipeline_mode = #tpu.pipeline_mode<synchronous>, transform_indices = @transform_4, window_bounds = array<i64: 32, 128>}, {pipeline_mode = #tpu.pipeline_mode<synchronous>, transform_indices = @transform_5, window_bounds = array<i64: 1, 128>}, {pipeline_mode = #tpu.pipeline_mode<synchronous>, transform_indices = @transform_6, window_bounds = array<i64: 8, 128>}]} {
    %c0 = arith.constant 0 : index
    %c0_0 = arith.constant 0 : index
    %0 = vector.load %arg4[%c0, %c0_0] : memref<1x128xf32, #tpu.memory_space<vmem>>, vector<1x128xf32>
    %1 = vector.shape_cast %0 : vector<1x128xf32> to vector<1x1x128xf32>
    %c0_1 = arith.constant 0 : index
    %c0_2 = arith.constant 0 : index
    %c0_3 = arith.constant 0 : index
    %2 = vector.load %arg1[%c0_1, %c0_2, %c0_3] : memref<8x8x1xf32, #tpu.memory_space<vmem>>, vector<8x8x1xf32>
    %c0_4 = arith.constant 0 : index
    %c0_5 = arith.constant 0 : index
    %3 = vector.load %arg2[%c0_4, %c0_5] : memref<1x128xf32, #tpu.memory_space<vmem>>, vector<1x128xf32>
    %4 = vector.shape_cast %3 : vector<1x128xf32> to vector<1x1x128xf32>
    %5 = vector.broadcast %2 : vector<8x8x1xf32> to vector<8x8x128xf32>
    %6 = vector.broadcast %4 : vector<1x1x128xf32> to vector<8x8x128xf32>
    %7 = arith.mulf %5, %6 : vector<8x8x128xf32>
    %8 = vector.broadcast %1 : vector<1x1x128xf32> to vector<8x8x128xf32>
    %9 = arith.addf %7, %8 : vector<8x8x128xf32>
    %c0_6 = arith.constant 0 : index
    %c0_7 = arith.constant 0 : index
    %c0_8 = arith.constant 0 : index
    %10 = vector.load %arg8[%c0_6, %c0_7, %c0_8] : memref<8x8x128xf32, #tpu.memory_space<vmem>>, vector<8x8x128xf32>
    tpu.vector_store %arg8[%c0_6, %c0_7, %c0_8], %9 {strides = array<i32>} : memref<8x8x128xf32, #tpu.memory_space<vmem>>, vector<8x8x128xf32>,
    %c0_9 = arith.constant 0 : index
    %c0_10 = arith.constant 0 : index
    %11 = vector.load %arg3[%c0_9, %c0_10] : memref<32x128xf32, #tpu.memory_space<vmem>>, vector<32x128xf32>
    %cst = arith.constant 0.000000e+00 : f32
    %12 = vector.broadcast %cst : f32 to vector<8x32xf32>
    %cst_11 = arith.constant 0.000000e+00 : f32
    %13 = vector.broadcast %cst_11 : f32 to vector<8x32xf32>
    %c0_i32 = arith.constant 0 : i32
    %14 = arith.index_cast %c0_i32 : i32 to index
    %c0_12 = arith.constant 0 : index
    %c0_13 = arith.constant 0 : index
    %15 = vector.load %arg8[%14, %c0_12, %c0_13] : memref<8x8x128xf32, #tpu.memory_space<vmem>>, vector<1x8x128xf32>
    %16 = vector.shape_cast %15 : vector<1x8x128xf32> to vector<8x128xf32>
    %cst_14 = arith.constant dense<0.000000e+00> : vector<8x128xf32>
    %17 = tpu.matmul %12, %11, %cst_14 {dimension_numbers = #tpu.dot_dimension_numbers<[1], [0], [0], [1], [0, 0, 1, 1], [], []>} : vector<8x32xf32>, vector<32x128xf32>, vector<8x128xf32> -> vector<8x128xf32>
    %18 = arith.addf %16, %17 : vector<8x128xf32>
    %19 = vector.extract_strided_slice %18 {offsets = [0, 0], sizes = [8, 32], strides = [1, 1]} : vector<8x128xf32> to vector<8x32xf32>
    %20 = math.tanh %19 : vector<8x32xf32>
    %21 = vector.extract_strided_slice %18 {offsets = [0, 32], sizes = [8, 32], strides = [1, 1]} : vector<8x128xf32> to vector<8x32xf32>
    %22 = arith.negf %21 : vector<8x32xf32>
    %23 = math.exp %22 : vector<8x32xf32>
    %cst_15 = arith.constant 1.000000e+00 : f32
    %24 = vector.broadcast %cst_15 : f32 to vector<8x32xf32>
    %25 = arith.addf %24, %23 : vector<8x32xf32>
    %26 = arith.divf %24, %25 : vector<8x32xf32>
    %27 = vector.extract_strided_slice %18 {offsets = [0, 64], sizes = [8, 32], strides = [1, 1]} : vector<8x128xf32> to vector<8x32xf32>
    %28 = arith.negf %27 : vector<8x32xf32>
    %29 = math.exp %28 : vector<8x32xf32>
    %cst_16 = arith.constant 1.000000e+00 : f32
    %30 = vector.broadcast %cst_16 : f32 to vector<8x32xf32>
    %31 = arith.addf %30, %29 : vector<8x32xf32>
    %32 = arith.divf %30, %31 : vector<8x32xf32>
    %33 = vector.extract_strided_slice %18 {offsets = [0, 96], sizes = [8, 32], strides = [1, 1]} : vector<8x128xf32> to vector<8x32xf32>
    %34 = arith.negf %33 : vector<8x32xf32>
    %35 = math.exp %34 : vector<8x32xf32>
    %cst_17 = arith.constant 1.000000e+00 : f32
    %36 = vector.broadcast %cst_17 : f32 to vector<8x32xf32>
    %37 = arith.addf %36, %35 : vector<8x32xf32>
    %38 = arith.divf %36, %37 : vector<8x32xf32>
    %39 = arith.mulf %20, %26 : vector<8x32xf32>
    %40 = arith.mulf %13, %32 : vector<8x32xf32>
    %41 = arith.addf %39, %40 : vector<8x32xf32>
    %42 = math.tanh %41 : vector<8x32xf32>
    %43 = arith.mulf %42, %38 : vector<8x32xf32>
    %c1_i32 = arith.constant 1 : i32
    %44 = arith.index_cast %c1_i32 : i32 to index
    %c0_18 = arith.constant 0 : index
    %c0_19 = arith.constant 0 : index
    %45 = vector.load %arg8[%44, %c0_18, %c0_19] : memref<8x8x128xf32, #tpu.memory_space<vmem>>, vector<1x8x128xf32>
    %46 = vector.shape_cast %45 : vector<1x8x128xf32> to vector<8x128xf32>
    %cst_20 = arith.constant dense<0.000000e+00> : vector<8x128xf32>
    %47 = tpu.matmul %43, %11, %cst_20 {dimension_numbers = #tpu.dot_dimension_numbers<[1], [0], [0], [1], [0, 0, 1, 1], [], []>} : vector<8x32xf32>, vector<32x128xf32>, vector<8x128xf32> -> vector<8x128xf32>
    %48 = arith.addf %46, %47 : vector<8x128xf32>
    %49 = vector.extract_strided_slice %48 {offsets = [0, 0], sizes = [8, 32], strides = [1, 1]} : vector<8x128xf32> to vector<8x32xf32>
    %50 = math.tanh %49 : vector<8x32xf32>
    %51 = vector.extract_strided_slice %48 {offsets = [0, 32], sizes = [8, 32], strides = [1, 1]} : vector<8x128xf32> to vector<8x32xf32>
    %52 = arith.negf %51 : vector<8x32xf32>
    %53 = math.exp %52 : vector<8x32xf32>
    %cst_21 = arith.constant 1.000000e+00 : f32
    %54 = vector.broadcast %cst_21 : f32 to vector<8x32xf32>
    %55 = arith.addf %54, %53 : vector<8x32xf32>
    %56 = arith.divf %54, %55 : vector<8x32xf32>
    %57 = vector.extract_strided_slice %48 {offsets = [0, 64], sizes = [8, 32], strides = [1, 1]} : vector<8x128xf32> to vector<8x32xf32>
    %58 = arith.negf %57 : vector<8x32xf32>
    %59 = math.exp %58 : vector<8x32xf32>
    %cst_22 = arith.constant 1.000000e+00 : f32
    %60 = vector.broadcast %cst_22 : f32 to vector<8x32xf32>
    %61 = arith.addf %60, %59 : vector<8x32xf32>
    %62 = arith.divf %60, %61 : vector<8x32xf32>
    %63 = vector.extract_strided_slice %48 {offsets = [0, 96], sizes = [8, 32], strides = [1, 1]} : vector<8x128xf32> to vector<8x32xf32>
    %64 = arith.negf %63 : vector<8x32xf32>
    %65 = math.exp %64 : vector<8x32xf32>
    %cst_23 = arith.constant 1.000000e+00 : f32
    %66 = vector.broadcast %cst_23 : f32 to vector<8x32xf32>
    %67 = arith.addf %66, %65 : vector<8x32xf32>
    %68 = arith.divf %66, %67 : vector<8x32xf32>
    %69 = arith.mulf %50, %56 : vector<8x32xf32>
    %70 = arith.mulf %41, %62 : vector<8x32xf32>
    %71 = arith.addf %69, %70 : vector<8x32xf32>
    %72 = math.tanh %71 : vector<8x32xf32>
    %73 = arith.mulf %72, %68 : vector<8x32xf32>
    %c2_i32 = arith.constant 2 : i32
    %74 = arith.index_cast %c2_i32 : i32 to index
    %c0_24 = arith.constant 0 : index
    %c0_25 = arith.constant 0 : index
    %75 = vector.load %arg8[%74, %c0_24, %c0_25] : memref<8x8x128xf32, #tpu.memory_space<vmem>>, vector<1x8x128xf32>
    %76 = vector.shape_cast %75 : vector<1x8x128xf32> to vector<8x128xf32>
    %cst_26 = arith.constant dense<0.000000e+00> : vector<8x128xf32>
    %77 = tpu.matmul %73, %11, %cst_26 {dimension_numbers = #tpu.dot_dimension_numbers<[1], [0], [0], [1], [0, 0, 1, 1], [], []>} : vector<8x32xf32>, vector<32x128xf32>, vector<8x128xf32> -> vector<8x128xf32>
    %78 = arith.addf %76, %77 : vector<8x128xf32>
    %79 = vector.extract_strided_slice %78 {offsets = [0, 0], sizes = [8, 32], strides = [1, 1]} : vector<8x128xf32> to vector<8x32xf32>
    %80 = math.tanh %79 : vector<8x32xf32>
    %81 = vector.extract_strided_slice %78 {offsets = [0, 32], sizes = [8, 32], strides = [1, 1]} : vector<8x128xf32> to vector<8x32xf32>
    %82 = arith.negf %81 : vector<8x32xf32>
    %83 = math.exp %82 : vector<8x32xf32>
    %cst_27 = arith.constant 1.000000e+00 : f32
    %84 = vector.broadcast %cst_27 : f32 to vector<8x32xf32>
    %85 = arith.addf %84, %83 : vector<8x32xf32>
    %86 = arith.divf %84, %85 : vector<8x32xf32>
    %87 = vector.extract_strided_slice %78 {offsets = [0, 64], sizes = [8, 32], strides = [1, 1]} : vector<8x128xf32> to vector<8x32xf32>
    %88 = arith.negf %87 : vector<8x32xf32>
    %89 = math.exp %88 : vector<8x32xf32>
    %cst_28 = arith.constant 1.000000e+00 : f32
    %90 = vector.broadcast %cst_28 : f32 to vector<8x32xf32>
    %91 = arith.addf %90, %89 : vector<8x32xf32>
    %92 = arith.divf %90, %91 : vector<8x32xf32>
    %93 = vector.extract_strided_slice %78 {offsets = [0, 96], sizes = [8, 32], strides = [1, 1]} : vector<8x128xf32> to vector<8x32xf32>
    %94 = arith.negf %93 : vector<8x32xf32>
    %95 = math.exp %94 : vector<8x32xf32>
    %cst_29 = arith.constant 1.000000e+00 : f32
    %96 = vector.broadcast %cst_29 : f32 to vector<8x32xf32>
    %97 = arith.addf %96, %95 : vector<8x32xf32>
    %98 = arith.divf %96, %97 : vector<8x32xf32>
    %99 = arith.mulf %80, %86 : vector<8x32xf32>
    %100 = arith.mulf %71, %92 : vector<8x32xf32>
    %101 = arith.addf %99, %100 : vector<8x32xf32>
    %102 = math.tanh %101 : vector<8x32xf32>
    %103 = arith.mulf %102, %98 : vector<8x32xf32>
    %c3_i32 = arith.constant 3 : i32
    %104 = arith.index_cast %c3_i32 : i32 to index
    %c0_30 = arith.constant 0 : index
    %c0_31 = arith.constant 0 : index
    %105 = vector.load %arg8[%104, %c0_30, %c0_31] : memref<8x8x128xf32, #tpu.memory_space<vmem>>, vector<1x8x128xf32>
    %106 = vector.shape_cast %105 : vector<1x8x128xf32> to vector<8x128xf32>
    %cst_32 = arith.constant dense<0.000000e+00> : vector<8x128xf32>
    %107 = tpu.matmul %103, %11, %cst_32 {dimension_numbers = #tpu.dot_dimension_numbers<[1], [0], [0], [1], [0, 0, 1, 1], [], []>} : vector<8x32xf32>, vector<32x128xf32>, vector<8x128xf32> -> vector<8x128xf32>
    %108 = arith.addf %106, %107 : vector<8x128xf32>
    %109 = vector.extract_strided_slice %108 {offsets = [0, 0], sizes = [8, 32], strides = [1, 1]} : vector<8x128xf32> to vector<8x32xf32>
    %110 = math.tanh %109 : vector<8x32xf32>
    %111 = vector.extract_strided_slice %108 {offsets = [0, 32], sizes = [8, 32], strides = [1, 1]} : vector<8x128xf32> to vector<8x32xf32>
    %112 = arith.negf %111 : vector<8x32xf32>
    %113 = math.exp %112 : vector<8x32xf32>
    %cst_33 = arith.constant 1.000000e+00 : f32
    %114 = vector.broadcast %cst_33 : f32 to vector<8x32xf32>
    %115 = arith.addf %114, %113 : vector<8x32xf32>
    %116 = arith.divf %114, %115 : vector<8x32xf32>
    %117 = vector.extract_strided_slice %108 {offsets = [0, 64], sizes = [8, 32], strides = [1, 1]} : vector<8x128xf32> to vector<8x32xf32>
    %118 = arith.negf %117 : vector<8x32xf32>
    %119 = math.exp %118 : vector<8x32xf32>
    %cst_34 = arith.constant 1.000000e+00 : f32
    %120 = vector.broadcast %cst_34 : f32 to vector<8x32xf32>
    %121 = arith.addf %120, %119 : vector<8x32xf32>
    %122 = arith.divf %120, %121 : vector<8x32xf32>
    %123 = vector.extract_strided_slice %108 {offsets = [0, 96], sizes = [8, 32], strides = [1, 1]} : vector<8x128xf32> to vector<8x32xf32>
    %124 = arith.negf %123 : vector<8x32xf32>
    %125 = math.exp %124 : vector<8x32xf32>
    %cst_35 = arith.constant 1.000000e+00 : f32
    %126 = vector.broadcast %cst_35 : f32 to vector<8x32xf32>
    %127 = arith.addf %126, %125 : vector<8x32xf32>
    %128 = arith.divf %126, %127 : vector<8x32xf32>
    %129 = arith.mulf %110, %116 : vector<8x32xf32>
    %130 = arith.mulf %101, %122 : vector<8x32xf32>
    %131 = arith.addf %129, %130 : vector<8x32xf32>
    %132 = math.tanh %131 : vector<8x32xf32>
    %133 = arith.mulf %132, %128 : vector<8x32xf32>
    %c4_i32 = arith.constant 4 : i32
    %134 = arith.index_cast %c4_i32 : i32 to index
    %c0_36 = arith.constant 0 : index
    %c0_37 = arith.constant 0 : index
    %135 = vector.load %arg8[%134, %c0_36, %c0_37] : memref<8x8x128xf32, #tpu.memory_space<vmem>>, vector<1x8x128xf32>
    %136 = vector.shape_cast %135 : vector<1x8x128xf32> to vector<8x128xf32>
    %cst_38 = arith.constant dense<0.000000e+00> : vector<8x128xf32>
    %137 = tpu.matmul %133, %11, %cst_38 {dimension_numbers = #tpu.dot_dimension_numbers<[1], [0], [0], [1], [0, 0, 1, 1], [], []>} : vector<8x32xf32>, vector<32x128xf32>, vector<8x128xf32> -> vector<8x128xf32>
    %138 = arith.addf %136, %137 : vector<8x128xf32>
    %139 = vector.extract_strided_slice %138 {offsets = [0, 0], sizes = [8, 32], strides = [1, 1]} : vector<8x128xf32> to vector<8x32xf32>
    %140 = math.tanh %139 : vector<8x32xf32>
    %141 = vector.extract_strided_slice %138 {offsets = [0, 32], sizes = [8, 32], strides = [1, 1]} : vector<8x128xf32> to vector<8x32xf32>
    %142 = arith.negf %141 : vector<8x32xf32>
    %143 = math.exp %142 : vector<8x32xf32>
    %cst_39 = arith.constant 1.000000e+00 : f32
    %144 = vector.broadcast %cst_39 : f32 to vector<8x32xf32>
    %145 = arith.addf %144, %143 : vector<8x32xf32>
    %146 = arith.divf %144, %145 : vector<8x32xf32>
    %147 = vector.extract_strided_slice %138 {offsets = [0, 64], sizes = [8, 32], strides = [1, 1]} : vector<8x128xf32> to vector<8x32xf32>
    %148 = arith.negf %147 : vector<8x32xf32>
    %149 = math.exp %148 : vector<8x32xf32>
    %cst_40 = arith.constant 1.000000e+00 : f32
    %150 = vector.broadcast %cst_40 : f32 to vector<8x32xf32>
    %151 = arith.addf %150, %149 : vector<8x32xf32>
    %152 = arith.divf %150, %151 : vector<8x32xf32>
    %153 = vector.extract_strided_slice %138 {offsets = [0, 96], sizes = [8, 32], strides = [1, 1]} : vector<8x128xf32> to vector<8x32xf32>
    %154 = arith.negf %153 : vector<8x32xf32>
    %155 = math.exp %154 : vector<8x32xf32>
    %cst_41 = arith.constant 1.000000e+00 : f32
    %156 = vector.broadcast %cst_41 : f32 to vector<8x32xf32>
    %157 = arith.addf %156, %155 : vector<8x32xf32>
    %158 = arith.divf %156, %157 : vector<8x32xf32>
    %159 = arith.mulf %140, %146 : vector<8x32xf32>
    %160 = arith.mulf %131, %152 : vector<8x32xf32>
    %161 = arith.addf %159, %160 : vector<8x32xf32>
    %162 = math.tanh %161 : vector<8x32xf32>
    %163 = arith.mulf %162, %158 : vector<8x32xf32>
    %c5_i32 = arith.constant 5 : i32
    %164 = arith.index_cast %c5_i32 : i32 to index
    %c0_42 = arith.constant 0 : index
    %c0_43 = arith.constant 0 : index
    %165 = vector.load %arg8[%164, %c0_42, %c0_43] : memref<8x8x128xf32, #tpu.memory_space<vmem>>, vector<1x8x128xf32>
    %166 = vector.shape_cast %165 : vector<1x8x128xf32> to vector<8x128xf32>
    %cst_44 = arith.constant dense<0.000000e+00> : vector<8x128xf32>
    %167 = tpu.matmul %163, %11, %cst_44 {dimension_numbers = #tpu.dot_dimension_numbers<[1], [0], [0], [1], [0, 0, 1, 1], [], []>} : vector<8x32xf32>, vector<32x128xf32>, vector<8x128xf32> -> vector<8x128xf32>
    %168 = arith.addf %166, %167 : vector<8x128xf32>
    %169 = vector.extract_strided_slice %168 {offsets = [0, 0], sizes = [8, 32], strides = [1, 1]} : vector<8x128xf32> to vector<8x32xf32>
    %170 = math.tanh %169 : vector<8x32xf32>
    %171 = vector.extract_strided_slice %168 {offsets = [0, 32], sizes = [8, 32], strides = [1, 1]} : vector<8x128xf32> to vector<8x32xf32>
    %172 = arith.negf %171 : vector<8x32xf32>
    %173 = math.exp %172 : vector<8x32xf32>
    %cst_45 = arith.constant 1.000000e+00 : f32
    %174 = vector.broadcast %cst_45 : f32 to vector<8x32xf32>
    %175 = arith.addf %174, %173 : vector<8x32xf32>
    %176 = arith.divf %174, %175 : vector<8x32xf32>
    %177 = vector.extract_strided_slice %168 {offsets = [0, 64], sizes = [8, 32], strides = [1, 1]} : vector<8x128xf32> to vector<8x32xf32>
    %178 = arith.negf %177 : vector<8x32xf32>
    %179 = math.exp %178 : vector<8x32xf32>
    %cst_46 = arith.constant 1.000000e+00 : f32
    %180 = vector.broadcast %cst_46 : f32 to vector<8x32xf32>
    %181 = arith.addf %180, %179 : vector<8x32xf32>
    %182 = arith.divf %180, %181 : vector<8x32xf32>
    %183 = vector.extract_strided_slice %168 {offsets = [0, 96], sizes = [8, 32], strides = [1, 1]} : vector<8x128xf32> to vector<8x32xf32>
    %184 = arith.negf %183 : vector<8x32xf32>
    %185 = math.exp %184 : vector<8x32xf32>
    %cst_47 = arith.constant 1.000000e+00 : f32
    %186 = vector.broadcast %cst_47 : f32 to vector<8x32xf32>
    %187 = arith.addf %186, %185 : vector<8x32xf32>
    %188 = arith.divf %186, %187 : vector<8x32xf32>
    %189 = arith.mulf %170, %176 : vector<8x32xf32>
    %190 = arith.mulf %161, %182 : vector<8x32xf32>
    %191 = arith.addf %189, %190 : vector<8x32xf32>
    %192 = math.tanh %191 : vector<8x32xf32>
    %193 = arith.mulf %192, %188 : vector<8x32xf32>
    %c6_i32 = arith.constant 6 : i32
    %194 = arith.index_cast %c6_i32 : i32 to index
    %c0_48 = arith.constant 0 : index
    %c0_49 = arith.constant 0 : index
    %195 = vector.load %arg8[%194, %c0_48, %c0_49] : memref<8x8x128xf32, #tpu.memory_space<vmem>>, vector<1x8x128xf32>
    %196 = vector.shape_cast %195 : vector<1x8x128xf32> to vector<8x128xf32>
    %cst_50 = arith.constant dense<0.000000e+00> : vector<8x128xf32>
    %197 = tpu.matmul %193, %11, %cst_50 {dimension_numbers = #tpu.dot_dimension_numbers<[1], [0], [0], [1], [0, 0, 1, 1], [], []>} : vector<8x32xf32>, vector<32x128xf32>, vector<8x128xf32> -> vector<8x128xf32>
    %198 = arith.addf %196, %197 : vector<8x128xf32>
    %199 = vector.extract_strided_slice %198 {offsets = [0, 0], sizes = [8, 32], strides = [1, 1]} : vector<8x128xf32> to vector<8x32xf32>
    %200 = math.tanh %199 : vector<8x32xf32>
    %201 = vector.extract_strided_slice %198 {offsets = [0, 32], sizes = [8, 32], strides = [1, 1]} : vector<8x128xf32> to vector<8x32xf32>
    %202 = arith.negf %201 : vector<8x32xf32>
    %203 = math.exp %202 : vector<8x32xf32>
    %cst_51 = arith.constant 1.000000e+00 : f32
    %204 = vector.broadcast %cst_51 : f32 to vector<8x32xf32>
    %205 = arith.addf %204, %203 : vector<8x32xf32>
    %206 = arith.divf %204, %205 : vector<8x32xf32>
    %207 = vector.extract_strided_slice %198 {offsets = [0, 64], sizes = [8, 32], strides = [1, 1]} : vector<8x128xf32> to vector<8x32xf32>
    %208 = arith.negf %207 : vector<8x32xf32>
    %209 = math.exp %208 : vector<8x32xf32>
    %cst_52 = arith.constant 1.000000e+00 : f32
    %210 = vector.broadcast %cst_52 : f32 to vector<8x32xf32>
    %211 = arith.addf %210, %209 : vector<8x32xf32>
    %212 = arith.divf %210, %211 : vector<8x32xf32>
    %213 = vector.extract_strided_slice %198 {offsets = [0, 96], sizes = [8, 32], strides = [1, 1]} : vector<8x128xf32> to vector<8x32xf32>
    %214 = arith.negf %213 : vector<8x32xf32>
    %215 = math.exp %214 : vector<8x32xf32>
    %cst_53 = arith.constant 1.000000e+00 : f32
    %216 = vector.broadcast %cst_53 : f32 to vector<8x32xf32>
    %217 = arith.addf %216, %215 : vector<8x32xf32>
    %218 = arith.divf %216, %217 : vector<8x32xf32>
    %219 = arith.mulf %200, %206 : vector<8x32xf32>
    %220 = arith.mulf %191, %212 : vector<8x32xf32>
    %221 = arith.addf %219, %220 : vector<8x32xf32>
    %222 = math.tanh %221 : vector<8x32xf32>
    %223 = arith.mulf %222, %218 : vector<8x32xf32>
    %c7_i32 = arith.constant 7 : i32
    %224 = arith.index_cast %c7_i32 : i32 to index
    %c0_54 = arith.constant 0 : index
    %c0_55 = arith.constant 0 : index
    %225 = vector.load %arg8[%224, %c0_54, %c0_55] : memref<8x8x128xf32, #tpu.memory_space<vmem>>, vector<1x8x128xf32>
    %226 = vector.shape_cast %225 : vector<1x8x128xf32> to vector<8x128xf32>
    %cst_56 = arith.constant dense<0.000000e+00> : vector<8x128xf32>
    %227 = tpu.matmul %223, %11, %cst_56 {dimension_numbers = #tpu.dot_dimension_numbers<[1], [0], [0], [1], [0, 0, 1, 1], [], []>} : vector<8x32xf32>, vector<32x128xf32>, vector<8x128xf32> -> vector<8x128xf32>
    %228 = arith.addf %226, %227 : vector<8x128xf32>
    %229 = vector.extract_strided_slice %228 {offsets = [0, 0], sizes = [8, 32], strides = [1, 1]} : vector<8x128xf32> to vector<8x32xf32>
    %230 = math.tanh %229 : vector<8x32xf32>
    %231 = vector.extract_strided_slice %228 {offsets = [0, 32], sizes = [8, 32], strides = [1, 1]} : vector<8x128xf32> to vector<8x32xf32>
    %232 = arith.negf %231 : vector<8x32xf32>
    %233 = math.exp %232 : vector<8x32xf32>
    %cst_57 = arith.constant 1.000000e+00 : f32
    %234 = vector.broadcast %cst_57 : f32 to vector<8x32xf32>
    %235 = arith.addf %234, %233 : vector<8x32xf32>
    %236 = arith.divf %234, %235 : vector<8x32xf32>
    %237 = vector.extract_strided_slice %228 {offsets = [0, 64], sizes = [8, 32], strides = [1, 1]} : vector<8x128xf32> to vector<8x32xf32>
    %238 = arith.negf %237 : vector<8x32xf32>
    %239 = math.exp %238 : vector<8x32xf32>
    %cst_58 = arith.constant 1.000000e+00 : f32
    %240 = vector.broadcast %cst_58 : f32 to vector<8x32xf32>
    %241 = arith.addf %240, %239 : vector<8x32xf32>
    %242 = arith.divf %240, %241 : vector<8x32xf32>
    %243 = vector.extract_strided_slice %228 {offsets = [0, 96], sizes = [8, 32], strides = [1, 1]} : vector<8x128xf32> to vector<8x32xf32>
    %244 = arith.negf %243 : vector<8x32xf32>
    %245 = math.exp %244 : vector<8x32xf32>
    %cst_59 = arith.constant 1.000000e+00 : f32
    %246 = vector.broadcast %cst_59 : f32 to vector<8x32xf32>
    %247 = arith.addf %246, %245 : vector<8x32xf32>
    %248 = arith.divf %246, %247 : vector<8x32xf32>
    %249 = arith.mulf %230, %236 : vector<8x32xf32>
    %250 = arith.mulf %221, %242 : vector<8x32xf32>
    %251 = arith.addf %249, %250 : vector<8x32xf32>
    %252 = math.tanh %251 : vector<8x32xf32>
    %253 = arith.mulf %252, %248 : vector<8x32xf32>
    %c8_i32 = arith.constant 8 : i32
    %c0_60 = arith.constant 0 : index
    %c0_61 = arith.constant 0 : index
    %254 = vector.load %arg5[%c0_60, %c0_61] : memref<32x128xf32, #tpu.memory_space<vmem>>, vector<32x128xf32>
    %cst_62 = arith.constant dense<0.000000e+00> : vector<8x128xf32>
    %255 = tpu.matmul %253, %254, %cst_62 {dimension_numbers = #tpu.dot_dimension_numbers<[1], [0], [0], [1], [0, 0, 1, 1], [], []>} : vector<8x32xf32>, vector<32x128xf32>, vector<8x128xf32> -> vector<8x128xf32>
    %c0_63 = arith.constant 0 : index
    %c0_64 = arith.constant 0 : index
    %256 = vector.load %arg6[%c0_63, %c0_64] : memref<1x128xf32, #tpu.memory_space<vmem>>, vector<1x128xf32>
    %257 = vector.broadcast %256 : vector<1x128xf32> to vector<8x128xf32>
    %258 = arith.addf %255, %257 : vector<8x128xf32>
    %c0_65 = arith.constant 0 : index
    %c0_66 = arith.constant 0 : index
    %259 = vector.load %arg7[%c0_65, %c0_66] : memref<8x128xf32, #tpu.memory_space<vmem>>, vector<8x128xf32>
    tpu.vector_store %arg7[%c0_65, %c0_66], %258 {strides = array<i32>} : memref<8x128xf32, #tpu.memory_space<vmem>>, vector<8x128xf32>,
    return
  }
  func.func @transform_0(%arg0: i32) -> (i32, i32, i32) {
    %c0_i32 = arith.constant 0 : i32
    %c0_i32_0 = arith.constant 0 : i32
    %c0_i32_1 = arith.constant 0 : i32
    %c0_i32_2 = arith.constant 0 : i32
    return %c0_i32, %c0_i32_0, %c0_i32_1 : i32, i32, i32
  }
  func.func @transform_1(%arg0: i32) -> (i32, i32) {
    %c0_i32 = arith.constant 0 : i32
    %c0_i32_0 = arith.constant 0 : i32
    %c0_i32_1 = arith.constant 0 : i32
    return %c0_i32, %c0_i32_0 : i32, i32
  }
  func.func @transform_2(%arg0: i32) -> (i32, i32) {
    %c0_i32 = arith.constant 0 : i32
    %c0_i32_0 = arith.constant 0 : i32
    %c0_i32_1 = arith.constant 0 : i32
    return %c0_i32, %c0_i32_0 : i32, i32
  }
  func.func @transform_3(%arg0: i32) -> (i32, i32) {
    %c0_i32 = arith.constant 0 : i32
    %c0_i32_0 = arith.constant 0 : i32
    %c0_i32_1 = arith.constant 0 : i32
    return %c0_i32, %c0_i32_0 : i32, i32
  }
  func.func @transform_4(%arg0: i32) -> (i32, i32) {
    %c0_i32 = arith.constant 0 : i32
    %c0_i32_0 = arith.constant 0 : i32
    %c0_i32_1 = arith.constant 0 : i32
    return %c0_i32, %c0_i32_0 : i32, i32
  }
  func.func @transform_5(%arg0: i32) -> (i32, i32) {
    %c0_i32 = arith.constant 0 : i32
    %c0_i32_0 = arith.constant 0 : i32
    %c0_i32_1 = arith.constant 0 : i32
    return %c0_i32, %c0_i32_0 : i32, i32
  }
  func.func @transform_6(%arg0: i32) -> (i32, i32) {
    %c0_i32 = arith.constant 0 : i32
    %c0_i32_0 = arith.constant 0 : i32
    %c0_i32_1 = arith.constant 0 : i32
    return %c0_i32, %c0_i32_0 : i32, i32
  }
}

</mosaic_0001>

<bundles_post_ra>
// kernel: tpu_custom_call.1
= control target key start
LH: loop header
LB: loop body
LE: loop exit
PB: predicated region body
PF: predicated region fallthrough
CT: control target
= control target key end

     0   :  { %v1312_v3 = vmov 0.0|0.0   ;;  %vm1313_vm0 = vmmov 0   ;;  %v1314_v6 = vmov 0.0   ;;  %v1315_v8 = vmov 0   ;;  %s1533_s0 = inlined_call_operand.vmem [shape: f32[8,8,1], index: 0, kind: input, shape index: {}]   ;;  %s1534_s1 = inlined_call_operand.vmem [shape: f32[1,128], index: 1, kind: input, shape index: {}]   ;;  %s1535_s2 = inlined_call_operand.vmem [shape: f32[32,128], index: 2, kind: input, shape index: {}]   ;;  %s1536_s3 = inlined_call_operand.vmem [shape: f32[1,128], index: 3, kind: input, shape index: {}]   ;;  %s1537_s4 = inlined_call_operand.vmem [shape: f32[32,128], index: 4, kind: input, shape index: {}]   ;;  %s1538_s5 = inlined_call_operand.vmem [shape: f32[1,128], index: 5, kind: input, shape index: {}]   ;;  %s1539_s6 = inlined_call_operand.hbm [shape: f32[8,128], index: 6, kind: output, shape index: {}]  }
   0x1   :  { %v110_v0 = vld [vmem:[%s1535_s2] sm:$0xff]  ;;  %v111_v1 = vld [vmem:[%s1535_s2 + $0x8] sm:$0xff]  ;;  %v112_v2 = vld [vmem:[%s1535_s2 + $0x10] sm:$0xff]  ;;  %1161 = vmatprep.subr.bf16.mxu0 %v1312_v3  ;;  %1070 = vmatprep.mubr.msk.f32.mxu0 %vm1313_vm0, %v1314_v6 }
   0x2   :  { %v1365_v4 = vpack.c.bf16 %v111_v1, %v110_v0  ;;  %v113_v5 = vld [vmem:[%s1535_s2 + $0x18] sm:$0xff]  ;;  %v25_v7 = vld [vmem:[%s1533_s0] sm:$0xff]  ;;  %1223 = vset.pattern.permute.xlu0 %v1315_v8  ;;  %1167 = vmatprep.subr.bf16.mxu1 %v1312_v3 }
   0x3   :  { %11 = vsyncpa [#allocation4], 0  ;;  %v1377_v9 = vpack.c.bf16 %v113_v5, %v112_v2  ;;  %36 = vperm.xlu0 %1223, %v25_v7   ;;  %1081 = vmatprep.mubr.msk.f32.mxu1 %vm1313_vm0, %v1314_v6  ;;  %v1398_v10 = vld [vmem:[%s1534_s1] ss:$0 sm:$0xff]  ;;  %s1316_s1 = smov 96   ;;  %v26_v23 = vld [vmem:[%s1533_s0 + $0x8] sm:$0xff] }
   0x4   :  { %1163 = vmatpush3.bf16.msra.mxu0 %v1365_v4  ;;  %1169 = vmatpush3.bf16.msra.mxu1 %v1365_v4  ;;  %v1404_v13 = vld [vmem:[%s1536_s3] ss:$0 sm:$0xff]  ;;  %s1317_s3 = smov 64   ;;  %s1318_s12 = smov 32   ;;  %vm115_vm1 = vcmask 261120   ;;  %v27_v42 = vld [vmem:[%s1533_s0 + $0x10] sm:$0xff] }
   0x5   :  { %1164 = vmatprep.subr.bf16.mxu0 %v1312_v3  ;;  %1170 = vmatprep.subr.bf16.mxu1 %v1312_v3  ;;  %v28_v62 = vld [vmem:[%s1533_s0 + $0x18] sm:$0xff]  ;;  %s1319_s8 = smov [#allocation3]  }
   0x6   :  { %s990_s9 = sshll.u32 %s1319_s8, 4  ;;  %s991_s9 = int_to_ptr.vmem [resolvable:$true] %s990_s9 }
   0x7   :  { %p1293_p1 = scmp.lt.s32.totalorder %s991_s9, %s991_s9 }
   0x8   :  { %1166 = vmatpush3.bf16.msra.mxu0 %v1377_v9  ;;  %1172 = vmatpush3.bf16.msra.mxu1 %v1377_v9 }
   0x9   :  { %1173 = vmatprep.subr.bf16.mxu0 %v1312_v3  ;;  %1179 = vmatprep.subr.bf16.mxu1 %v1312_v3 }
   0xb   :  { %1071 = vmatmul.mubr.f32.vlgmr.msra.gmra.mrb[0].mxu0 %v1314_v6 }
   0xc   :  { %1175 = vmatpush3.bf16.msra.mxu0 %v1365_v4  ;;  %1092 = vmatprep.mubr.msk.f32.mxu0 %vm1313_vm0, %v1314_v6 }
   0xd   :  { %1176 = vmatprep.subr.bf16.mxu0 %v1312_v3 }
  0x10   :  { %1178 = vmatpush3.bf16.msra.mxu0 %v1377_v9 }
  0x11   :  { %1185 = vmatprep.subr.bf16.mxu0 %v1312_v3 }
  0x82   :  { %v37_v11 = vpop.permute.xlu0 %36 }
  0x83   :  { %v80_v12 = vmul.f32 %v1398_v10, %v37_v11 }
  0x85   :  { %v94_v14 = vadd.f32 %v1404_v13, %v80_v12 }
  0xde   :  { %v185_v15 = vpop.f32.mrb[0].mxu0 }
  0xdf   :  { %v189_v16 = vadd.f32 %v185_v15, %v94_v14  ;;  %v1072_v17 = vpop.f32.mrb[1].mxu0 }
  0xe1   :  { %v1000_v18 = vmul.f32 -1.442695, %v189_v16 }
  0xe3   :  { %1224 = vpow2.f32 %v1000_v18 }
  0xed   :  { %v1225_v19 = vpop.eup %1224 }
  0xee   :  { %v194_v20 = vadd.f32 1.0, %v1225_v19 }
  0xf0   :  { %1226 = vrcp.f32 %v194_v20 }
  0xf1   :  { %1228 = vtanh.f32 %v189_v16 }
  0xfa   :  { %v1227_v21 = vpop.eup %1226 }
  0xfb   :  { %198 = vrot.lane.b32.xlu0 %v1227_v21, %s1316_s1  ;;  %v202_v22 = vmul.f32 0.0, %v1227_v21  ;;  %v1229_v24 = vpop.eup %1228 }
  0xfd   :  { %204 = vrot.lane.b32.xlu1 %v202_v22, %s1317_s3 }
  0xff   :  { %41 = vperm.xlu0 %1223, %v26_v23  }
 0x101   :  { %209 = vrot.lane.b32.xlu1 %v1227_v21, %s1318_s12 }
 0x16d   :  { %v199_v25 = vpop.permute.xlu0 %198 }
 0x16e   :  { %v201_v26 = vmul.f32 %v1229_v24, %v199_v25  ;;  %v29_v24 = vld [vmem:[%s1533_s0 + $0x20] sm:$0xff] }
 0x16f   :  { %v205_v27 = vpop.permute.xlu1 %204 }
 0x170   :  { %v207_v28 = vadd.f32 %v205_v27, %v201_v26 }
 0x172   :  { %1230 = vtanh.f32 %v207_v28 }
 0x173   :  { %v210_v30 = vpop.permute.xlu1 %209 }
 0x17c   :  { %v1231_v29 = vpop.eup %1230 }
 0x17d   :  { %v212_v31 = vmul.f32 %v1231_v29, %v210_v30 }
 0x17e   :  { %v42_v32 = vpop.permute.xlu0 %41 }
 0x17f   :  { %1082 = vmatmul.mubr.msk.f32.vlgmr.msra.gmra.mrb[0].mxu1 %vm115_vm1, %v212_v31  ;;  %v81_v33 = vmul.f32 %v1398_v10, %v42_v32 }
 0x180   :  { %1181 = vmatpush3.bf16.msra.mxu1 %v1365_v4  ;;  %1103 = vmatprep.mubr.msk.f32.mxu1 %vm1313_vm0, %v1314_v6 }
 0x181   :  { %1182 = vmatprep.subr.bf16.mxu1 %v1312_v3  ;;  %v95_v34 = vadd.f32 %v1404_v13, %v81_v33 }
 0x184   :  { %1184 = vmatpush3.bf16.msra.mxu1 %v1377_v9 }
 0x185   :  { %1191 = vmatprep.subr.bf16.mxu1 %v1312_v3 }
 0x252   :  { %v284_v35 = vpop.f32.mrb[0].mxu1 }
 0x253   :  { %v288_v36 = vadd.f32 %v284_v35, %v95_v34  ;;  %v1083_v37 = vpop.f32.mrb[1].mxu1 }
 0x255   :  { %v1002_v38 = vmul.f32 -1.442695, %v288_v36 }
 0x257   :  { %1232 = vpow2.f32 %v1002_v38 }
 0x261   :  { %v1233_v39 = vpop.eup %1232 }
 0x262   :  { %v293_v40 = vadd.f32 1.0, %v1233_v39 }
 0x264   :  { %1234 = vrcp.f32 %v293_v40 }
 0x265   :  { %1236 = vtanh.f32 %v288_v36 }
 0x26e   :  { %v1235_v41 = vpop.eup %1234 }
 0x26f   :  { %301 = vrot.lane.b32.xlu0 %v1235_v41, %s1317_s3  ;;  %297 = vrot.lane.b32.xlu1 %v1235_v41, %s1316_s1  ;;  %v1237_v43 = vpop.eup %1236 }
 0x273   :  { %46 = vperm.xlu0 %1223, %v27_v42   ;;  %307 = vrot.lane.b32.xlu1 %v1235_v41, %s1318_s12 }
 0x2e1   :  { %v302_v44 = vpop.permute.xlu0 %301  ;;  %v298_v45 = vpop.permute.xlu1 %297 }
 0x2e2   :  { %v304_v46 = vmul.f32 %v302_v44, %v207_v28  ;;  %v300_v47 = vmul.f32 %v1237_v43, %v298_v45  ;;  %v30_v44 = vld [vmem:[%s1533_s0 + $0x28] sm:$0xff] }
 0x2e4   :  { %v305_v48 = vadd.f32 %v304_v46, %v300_v47 }
 0x2e5   :  { %v308_v50 = vpop.permute.xlu1 %307 }
 0x2e6   :  { %1238 = vtanh.f32 %v305_v48 }
 0x2f0   :  { %v1239_v49 = vpop.eup %1238 }
 0x2f1   :  { %v310_v51 = vmul.f32 %v1239_v49, %v308_v50 }
 0x2f2   :  { %v47_v52 = vpop.permute.xlu0 %46 }
 0x2f3   :  { %1093 = vmatmul.mubr.msk.f32.vlgmr.msra.gmra.mrb[2].mxu0 %vm115_vm1, %v310_v51  ;;  %v82_v53 = vmul.f32 %v1398_v10, %v47_v52 }
 0x2f4   :  { %1187 = vmatpush3.bf16.msra.mxu0 %v1365_v4  ;;  %1114 = vmatprep.mubr.msk.f32.mxu0 %vm1313_vm0, %v1314_v6 }
 0x2f5   :  { %1188 = vmatprep.subr.bf16.mxu0 %v1312_v3  ;;  %v96_v54 = vadd.f32 %v1404_v13, %v82_v53 }
 0x2f8   :  { %1190 = vmatpush3.bf16.msra.mxu0 %v1377_v9 }
 0x2f9   :  { %1197 = vmatprep.subr.bf16.mxu0 %v1312_v3 }
 0x3c6   :  { %v382_v55 = vpop.f32.mrb[2].mxu0 }
 0x3c7   :  { %v386_v56 = vadd.f32 %v382_v55, %v96_v54  ;;  %v1094_v57 = vpop.f32.mrb[3].mxu0 }
 0x3c9   :  { %v1004_v58 = vmul.f32 -1.442695, %v386_v56 }
 0x3cb   :  { %1240 = vpow2.f32 %v1004_v58 }
 0x3d5   :  { %v1241_v59 = vpop.eup %1240 }
 0x3d6   :  { %v391_v60 = vadd.f32 1.0, %v1241_v59 }
 0x3d8   :  { %1242 = vrcp.f32 %v391_v60 }
 0x3d9   :  { %1244 = vtanh.f32 %v386_v56 }
 0x3e2   :  { %v1243_v61 = vpop.eup %1242 }
 0x3e3   :  { %399 = vrot.lane.b32.xlu0 %v1243_v61, %s1317_s3  ;;  %395 = vrot.lane.b32.xlu1 %v1243_v61, %s1316_s1  ;;  %v1245_v63 = vpop.eup %1244 }
 0x3e7   :  { %51 = vperm.xlu0 %1223, %v28_v62   ;;  %405 = vrot.lane.b32.xlu1 %v1243_v61, %s1318_s12 }
 0x455   :  { %v400_v0 = vpop.permute.xlu0 %399  ;;  %v396_v1 = vpop.permute.xlu1 %395 }
 0x456   :  { %v402_v2 = vmul.f32 %v400_v0, %v305_v48  ;;  %v398_v5 = vmul.f32 %v1245_v63, %v396_v1 }
 0x458   :  { %v403_v7 = vadd.f32 %v402_v2, %v398_v5 }
 0x459   :  { %v406_v11 = vpop.permute.xlu1 %405 }
 0x45a   :  { %1246 = vtanh.f32 %v403_v7 }
 0x464   :  { %v1247_v8 = vpop.eup %1246 }
 0x465   :  { %v408_v12 = vmul.f32 %v1247_v8, %v406_v11 }
 0x466   :  { %v52_v14 = vpop.permute.xlu0 %51 }
 0x467   :  { %1104 = vmatmul.mubr.msk.f32.vlgmr.msra.gmra.mrb[2].mxu1 %vm115_vm1, %v408_v12  ;;  %v83_v15 = vmul.f32 %v1398_v10, %v52_v14 }
 0x468   :  { %1193 = vmatpush3.bf16.msra.mxu1 %v1365_v4  ;;  %1125 = vmatprep.mubr.msk.f32.mxu1 %vm1313_vm0, %v1314_v6 }
 0x469   :  { %1194 = vmatprep.subr.bf16.mxu1 %v1312_v3  ;;  %v97_v16 = vadd.f32 %v1404_v13, %v83_v15 }
 0x46c   :  { %1196 = vmatpush3.bf16.msra.mxu1 %v1377_v9 }
 0x46d   :  { %1203 = vmatprep.subr.bf16.mxu1 %v1312_v3 }
 0x53a   :  { %v480_v17 = vpop.f32.mrb[2].mxu1 }
 0x53b   :  { %v484_v18 = vadd.f32 %v480_v17, %v97_v16  ;;  %v1105_v19 = vpop.f32.mrb[3].mxu1 }
 0x53d   :  { %v1006_v20 = vmul.f32 -1.442695, %v484_v18 }
 0x53f   :  { %1248 = vpow2.f32 %v1006_v20 }
 0x549   :  { %v1249_v21 = vpop.eup %1248 }
 0x54a   :  { %v489_v22 = vadd.f32 1.0, %v1249_v21 }
 0x54c   :  { %1250 = vrcp.f32 %v489_v22 }
 0x54d   :  { %1252 = vtanh.f32 %v484_v18 }
 0x556   :  { %v1251_v23 = vpop.eup %1250 }
 0x557   :  { %497 = vrot.lane.b32.xlu0 %v1251_v23, %s1317_s3  ;;  %493 = vrot.lane.b32.xlu1 %v1251_v23, %s1316_s1  ;;  %v1253_v25 = vpop.eup %1252 }
 0x55b   :  { %56 = vperm.xlu0 %1223, %v29_v24   ;;  %503 = vrot.lane.b32.xlu1 %v1251_v23, %s1318_s12 }
 0x5c9   :  { %v498_v26 = vpop.permute.xlu0 %497  ;;  %v494_v27 = vpop.permute.xlu1 %493 }
 0x5ca   :  { %v500_v28 = vmul.f32 %v498_v26, %v403_v7  ;;  %v496_v29 = vmul.f32 %v1253_v25, %v494_v27 }
 0x5cc   :  { %v501_v30 = vadd.f32 %v500_v28, %v496_v29 }
 0x5cd   :  { %v504_v32 = vpop.permute.xlu1 %503 }
 0x5ce   :  { %1254 = vtanh.f32 %v501_v30 }
 0x5d8   :  { %v1255_v31 = vpop.eup %1254 }
 0x5d9   :  { %v506_v33 = vmul.f32 %v1255_v31, %v504_v32 }
 0x5da   :  { %v57_v34 = vpop.permute.xlu0 %56 }
 0x5db   :  { %1115 = vmatmul.mubr.msk.f32.vlgmr.msra.gmra.mrb[4].mxu0 %vm115_vm1, %v506_v33  ;;  %v84_v35 = vmul.f32 %v1398_v10, %v57_v34 }
 0x5dc   :  { %1199 = vmatpush3.bf16.msra.mxu0 %v1365_v4  ;;  %1136 = vmatprep.mubr.msk.f32.mxu0 %vm1313_vm0, %v1314_v6 }
 0x5dd   :  { %1200 = vmatprep.subr.bf16.mxu0 %v1312_v3  ;;  %v98_v36 = vadd.f32 %v1404_v13, %v84_v35 }
 0x5e0   :  { %1202 = vmatpush3.bf16.msra.mxu0 %v1377_v9 }
 0x5e1   :  { %1209 = vmatprep.subr.bf16.mxu0 %v1312_v3 }
 0x6ae   :  { %v578_v37 = vpop.f32.mrb[4].mxu0 }
 0x6af   :  { %v582_v38 = vadd.f32 %v578_v37, %v98_v36  ;;  %v1116_v39 = vpop.f32.mrb[5].mxu0 }
 0x6b1   :  { %v1008_v40 = vmul.f32 -1.442695, %v582_v38 }
 0x6b3   :  { %1256 = vpow2.f32 %v1008_v40 }
 0x6bd   :  { %v1257_v41 = vpop.eup %1256 }
 0x6be   :  { %v587_v42 = vadd.f32 1.0, %v1257_v41 }
 0x6c0   :  { %1258 = vrcp.f32 %v587_v42  ;;  %v899_v42 = vld [vmem:[%s1537_s4] sm:$0xff] }
 0x6c1   :  { %1260 = vtanh.f32 %v582_v38 }
 0x6ca   :  { %v1259_v43 = vpop.eup %1258 }
 0x6cb   :  { %595 = vrot.lane.b32.xlu0 %v1259_v43, %s1317_s3  ;;  %591 = vrot.lane.b32.xlu1 %v1259_v43, %s1316_s1  ;;  %v1261_v45 = vpop.eup %1260 }
 0x6cf   :  { %61 = vperm.xlu0 %1223, %v30_v44   ;;  %601 = vrot.lane.b32.xlu1 %v1259_v43, %s1318_s12  ;;  %v900_v43 = vld [vmem:[%s1537_s4 + $0x8] sm:$0xff] }
 0x6d0   :  { %v1210_v44 = vpack.c.bf16 %v900_v43, %v899_v42 }
 0x73d   :  { %v596_v46 = vpop.permute.xlu0 %595  ;;  %v592_v47 = vpop.permute.xlu1 %591 }
 0x73e   :  { %v598_v48 = vmul.f32 %v596_v46, %v501_v30  ;;  %v594_v49 = vmul.f32 %v1261_v45, %v592_v47 }
 0x740   :  { %v599_v50 = vadd.f32 %v598_v48, %v594_v49 }
 0x741   :  { %v602_v52 = vpop.permute.xlu1 %601 }
 0x742   :  { %1262 = vtanh.f32 %v599_v50 }
 0x74c   :  { %v1263_v51 = vpop.eup %1262 }
 0x74d   :  { %v604_v53 = vmul.f32 %v1263_v51, %v602_v52 }
 0x74e   :  { %v62_v54 = vpop.permute.xlu0 %61 }
 0x74f   :  { %1126 = vmatmul.mubr.msk.f32.vlgmr.msra.gmra.mrb[4].mxu1 %vm115_vm1, %v604_v53  ;;  %v85_v55 = vmul.f32 %v1398_v10, %v62_v54 }
 0x750   :  { %1205 = vmatpush3.bf16.msra.mxu1 %v1365_v4  ;;  %1147 = vmatprep.mubr.msk.f32.mxu1 %vm1313_vm0, %v1314_v6 }
 0x751   :  { %1206 = vmatprep.subr.bf16.mxu1 %v1312_v3  ;;  %v99_v56 = vadd.f32 %v1404_v13, %v85_v55  ;;  %v1015_v55 = vld [vmem:[%s1538_s5] ss:$0 sm:$0xff] }
 0x754   :  { %1208 = vmatpush3.bf16.msra.mxu1 %v1377_v9  ;;  %v31_v9 = vld [vmem:[%s1533_s0 + $0x30] sm:$0xff] }
 0x822   :  { %v676_v57 = vpop.f32.mrb[4].mxu1 }
 0x823   :  { %v680_v58 = vadd.f32 %v676_v57, %v99_v56  ;;  %v1127_v59 = vpop.f32.mrb[5].mxu1 }
 0x825   :  { %v1010_v60 = vmul.f32 -1.442695, %v680_v58 }
 0x827   :  { %1264 = vpow2.f32 %v1010_v60 }
 0x831   :  { %v1265_v61 = vpop.eup %1264 }
 0x832   :  { %v685_v62 = vadd.f32 1.0, %v1265_v61 }
 0x834   :  { %1266 = vrcp.f32 %v685_v62 }
 0x835   :  { %1268 = vtanh.f32 %v680_v58 }
 0x83e   :  { %v1267_v4 = vpop.eup %1266 }
 0x83f   :  { %693 = vrot.lane.b32.xlu0 %v1267_v4, %s1317_s3  ;;  %689 = vrot.lane.b32.xlu1 %v1267_v4, %s1316_s1  ;;  %v1269_v63 = vpop.eup %1268 }
 0x843   :  { %66 = vperm.xlu0 %1223, %v31_v9   ;;  %699 = vrot.lane.b32.xlu1 %v1267_v4, %s1318_s12 }
 0x8b1   :  { %v694_v0 = vpop.permute.xlu0 %693  ;;  %v690_v1 = vpop.permute.xlu1 %689 }
 0x8b2   :  { %v696_v2 = vmul.f32 %v694_v0, %v599_v50  ;;  %v692_v5 = vmul.f32 %v1269_v63, %v690_v1 }
 0x8b4   :  { %v697_v7 = vadd.f32 %v696_v2, %v692_v5 }
 0x8b5   :  { %v700_v11 = vpop.permute.xlu1 %699 }
 0x8b6   :  { %1270 = vtanh.f32 %v697_v7 }
 0x8c0   :  { %v1271_v8 = vpop.eup %1270 }
 0x8c1   :  { %v702_v12 = vmul.f32 %v1271_v8, %v700_v11 }
 0x8c2   :  { %v67_v14 = vpop.permute.xlu0 %66 }
 0x8c3   :  { %1137 = vmatmul.mubr.msk.f32.vlgmr.msra.gmra.mrb[6].mxu0 %vm115_vm1, %v702_v12  ;;  %v86_v15 = vmul.f32 %v1398_v10, %v67_v14 }
 0x8c4   :  { %1158 = vmatprep.mubr.msk.f32.mxu0 %vm1313_vm0, %v1314_v6  ;;  %v32_v6 = vld [vmem:[%s1533_s0 + $0x38] sm:$0xff]  ;;  %1211 = vmatpush3.bf16.msra.mxu0 %v1210_v44 }
 0x8c5   :  { %v100_v16 = vadd.f32 %v1404_v13, %v86_v15  ;;  %1212 = vmatprep.subr.bf16.mxu0 %v1312_v3 }
 0x996   :  { %v774_v17 = vpop.f32.mrb[6].mxu0 }
 0x997   :  { %v778_v18 = vadd.f32 %v774_v17, %v100_v16  ;;  %v1138_v19 = vpop.f32.mrb[7].mxu0 }
 0x999   :  { %v1012_v20 = vmul.f32 -1.442695, %v778_v18 }
 0x99b   :  { %1272 = vpow2.f32 %v1012_v20 }
 0x9a5   :  { %v1273_v21 = vpop.eup %1272 }
 0x9a6   :  { %v783_v22 = vadd.f32 1.0, %v1273_v21 }
 0x9a8   :  { %1274 = vrcp.f32 %v783_v22 }
 0x9a9   :  { %1276 = vtanh.f32 %v778_v18 }
 0x9b2   :  { %v1275_v23 = vpop.eup %1274 }
 0x9b3   :  { %791 = vrot.lane.b32.xlu0 %v1275_v23, %s1317_s3  ;;  %787 = vrot.lane.b32.xlu1 %v1275_v23, %s1316_s1  ;;  %v1277_v24 = vpop.eup %1276 }
 0x9b7   :  { %71 = vperm.xlu0 %1223, %v32_v6   ;;  %797 = vrot.lane.b32.xlu1 %v1275_v23, %s1318_s12 }
 0xa25   :  { %v792_v25 = vpop.permute.xlu0 %791  ;;  %v788_v26 = vpop.permute.xlu1 %787 }
 0xa26   :  { %v794_v27 = vmul.f32 %v792_v25, %v697_v7  ;;  %v790_v28 = vmul.f32 %v1277_v24, %v788_v26 }
 0xa28   :  { %v795_v29 = vadd.f32 %v794_v27, %v790_v28 }
 0xa29   :  { %v798_v31 = vpop.permute.xlu1 %797 }
 0xa2a   :  { %1278 = vtanh.f32 %v795_v29 }
 0xa34   :  { %v1279_v30 = vpop.eup %1278 }
 0xa35   :  { %v800_v32 = vmul.f32 %v1279_v30, %v798_v31 }
 0xa36   :  { %v72_v33 = vpop.permute.xlu0 %71 }
 0xa37   :  { %1148 = vmatmul.mubr.msk.f32.vlgmr.msra.gmra.mrb[6].mxu1 %vm115_vm1, %v800_v32  ;;  %v87_v34 = vmul.f32 %v1398_v10, %v72_v33  ;;  %v901_v10 = vld [vmem:[%s1537_s4 + $0x10] sm:$0xff] }
 0xa39   :  { %v101_v35 = vadd.f32 %v1404_v13, %v87_v34  ;;  %v902_v13 = vld [vmem:[%s1537_s4 + $0x18] sm:$0xff] }
 0xa3a   :  { %v1213_v46 = vpack.c.bf16 %v902_v13, %v901_v10 }
 0xa3c   :  { %1214 = vmatpush3.bf16.msra.mxu0 %v1213_v46 }
 0xb0a   :  { %v872_v36 = vpop.f32.mrb[6].mxu1 }
 0xb0b   :  { %v876_v37 = vadd.f32 %v872_v36, %v101_v35  ;;  %v1149_v38 = vpop.f32.mrb[7].mxu1 }
 0xb0d   :  { %v1014_v39 = vmul.f32 -1.442695, %v876_v37 }
 0xb0f   :  { %1280 = vpow2.f32 %v1014_v39 }
 0xb19   :  { %v1281_v40 = vpop.eup %1280 }
 0xb1a   :  { %v881_v41 = vadd.f32 1.0, %v1281_v40 }
 0xb1c   :  { %1282 = vrcp.f32 %v881_v41 }
 0xb1d   :  { %1284 = vtanh.f32 %v876_v37 }
 0xb26   :  { %v1283_v45 = vpop.eup %1282 }
 0xb27   :  { %889 = vrot.lane.b32.xlu0 %v1283_v45, %s1317_s3  ;;  %885 = vrot.lane.b32.xlu1 %v1283_v45, %s1316_s1  ;;  %v1285_v47 = vpop.eup %1284  ;;  %s1288_s1 = scalar_lea.vmem %s991_s9, 128 }
 0xb28   :  { %p1289_p0 = scmp.ne.s32.totalorder %s991_s9, %s1288_s1  ;;  %p1294_p2 = scmp.lt.s32.totalorder %s1288_s1, %s1288_s1 }
 0xb2a   :  { %p1295_p3 = por %p1294_p2, %p1293_p1 }
 0xb2b   :  { %895 = vrot.lane.b32.xlu1 %v1283_v45, %s1318_s12 }
 0xb2c   :  { %p1296_p4 = pnand %p1295_p3, %p1289_p0 }
 0xb99   :  { %v890_v3 = vpop.permute.xlu0 %889  ;;  %v886_v48 = vpop.permute.xlu1 %885 }
 0xb9a   :  { %v892_v49 = vmul.f32 %v890_v3, %v795_v29  ;;  %v888_v50 = vmul.f32 %v1285_v47, %v886_v48 }
 0xb9c   :  { %v893_v51 = vadd.f32 %v892_v49, %v888_v50 }
 0xb9d   :  { %v896_v53 = vpop.permute.xlu1 %895 }
 0xb9e   :  { %1286 = vtanh.f32 %v893_v51 }
 0xba8   :  { %v1287_v52 = vpop.eup %1286 }
 0xba9   :  { %v898_v54 = vmul.f32 %v1287_v52, %v896_v53 }
 0xbab   :  { %1159 = vmatmul.mubr.msk.f32.vlgmr.msra.gmra.mrb[8].mxu0 %vm115_vm1, %v898_v54 }
 0xc7e   :  { %v979_v56 = vpop.f32.mrb[8].mxu0 }
 0xc7f   :  { %v980_v57 = vadd.f32 %v1015_v55, %v979_v56  ;;  %v1160_v58 = vpop.f32.mrb[9].mxu0 }
 0xc81   :  { %983 = vst [vmem:[#allocation3] sm:$0xff] %v980_v57 }
 0xc82   :  { %1299 = shalt.err (!%p1296_p4)
}
 0xc83   :  { %s1300_s3 = scalar_lea.hbm %s1539_s6, 128 }
 0xc84   :  { %p1301_p5 = scmp.ne.s32.totalorder %s1539_s6, %s1300_s3  ;;  %p1304_p6 = scmp.lt.u32.totalorder %s1300_s3, %s1539_s6 }
 0xc86   :  { %p1306_p7 = pnand %p1304_p6, %p1301_p5 }
 0xc88   :  { %1309 = shalt.err (!%p1306_p7)
}
 0xc89   :  { %993 = dma.vmem_to_hbm [thread:$0]  %s991_s9, 128, %s1539_s6, [#allocation4]  }
 0xc8a   :  { %1310 = dma.done.wait [#allocation4], 128  }
 0xc8b   :  { %1311 = vsyncadd [#allocation4], 4294967168 }
 0xc8c   :  { %997 = vsyncpa [#allocation4], 1 }

</bundles_post_ra>
